<compile_context>
chip_gen: v7x
topology: tpu7x:2x2x1
jax: 0.10.0
libtpu: 0.0.40
codegen_flags: <defaults>
</compile_context>

<pallas_src>
import jax
import jax.numpy as jnp
from jax import lax
from jax.experimental import pallas as pl
from jax.experimental.pallas import tpu as pltpu


# ---------------------------------------------------------------------------
# Kernels
# ---------------------------------------------------------------------------
def _attention_kernel(g_ref, x_ref, wg_ref, wx_ref, wpsi_ref, b_ref, bp_ref,
                      o_ref):
    """Full-F_int version (intermediates (F_int, ts) fit comfortably)."""
    g = g_ref[0]                                   # (F_g, TS)
    x = x_ref[0]                                   # (F_l, TS)

    # W_g / W_x 1x1 convs as channel-contracting MXU matmuls (BN scales are
    # pre-folded into the weights); one merged per-channel bias add.
    g1 = jnp.dot(wg_ref[...], g, preferred_element_type=jnp.float32)
    x1 = jnp.dot(wx_ref[...], x, preferred_element_type=jnp.float32)
    h = jnp.maximum(g1 + x1 + b_ref[...], 0.0)     # (F_int, TS) f32

    # psi: N=1 projection on the VPU + sublane (XLU) reduce, then sigmoid (EUP).
    p = jnp.sum(h * wpsi_ref[...], axis=0, keepdims=True) + bp_ref[...]
    p = jax.nn.sigmoid(p)                          # (1, TS)

    # Gate the skip connection; psi broadcasts over the channel (sublane) axis.
    o_ref[0] = (x * p).astype(o_ref.dtype)


def _make_chunked_kernel(chunk, n_chunks):
    """Streams the psi reduction over F_int in `chunk`-row blocks so the
    (F_int, ts) f32 intermediates never fully materialize (used for large
    F_int where they would dominate the VMEM budget)."""

    def kernel(g_ref, x_ref, wg_ref, wx_ref, wpsi_ref, b_ref, bp_ref, o_ref):
        g = g_ref[0]                               # (F_g, TS)
        x = x_ref[0]                               # (F_l, TS)
        ts = g.shape[-1]

        def body(c, acc):
            r = pl.multiple_of(c * chunk, chunk)
            gc = jnp.dot(wg_ref[pl.ds(r, chunk), :], g,
                         preferred_element_type=jnp.float32)
            xc = jnp.dot(wx_ref[pl.ds(r, chunk), :], x,
                         preferred_element_type=jnp.float32)
            hc = jnp.maximum(gc + xc + b_ref[pl.ds(r, chunk), :], 0.0)
            return acc + jnp.sum(hc * wpsi_ref[pl.ds(r, chunk), :],
                                 axis=0, keepdims=True)

        acc0 = jnp.zeros((1, ts), jnp.float32)
        p = lax.fori_loop(0, n_chunks, body, acc0)
        p = jax.nn.sigmoid(p + bp_ref[...])        # (1, TS)
        o_ref[0] = (x * p).astype(o_ref.dtype)

    return kernel


# ---------------------------------------------------------------------------
# Wrapper
# ---------------------------------------------------------------------------
def attention_block_pallas(g_nchw, x_nchw, params, *,
                           target_tile_bytes=1 << 20):
    """Fused Attention_block forward.

    g_nchw: (N, F_g, H, W), x_nchw: (N, F_l, H, W).
    params: (wg, wx, wpsi, b, bp) with BN scales folded into the conv weights:
      wg: (F_int, F_g), wx: (F_int, F_l), wpsi: (F_int, 1),
      b:  (F_int, 1)   merged BN_g + BN_x bias,
      bp: (1, 1)       BN_psi bias.
    """
    wg, wx, wpsi, b, bp = params
    N, F_g, H, W = g_nchw.shape
    _, F_l, _, _ = x_nchw.shape
    F_int = wg.shape[0]
    S = H * W

    # NCHW viewed as (N, C, S) -- no transpose, just a reshape.
    g3 = g_nchw.reshape(N, F_g, S)
    x3 = x_nchw.reshape(N, F_l, S)

    # ----- psi-streaming decision (only pays off for big F_int) -----
    chunk = None
    if F_int > 128:
        for c in (128, 64, 32):
            if F_int % c == 0:
                chunk = c
                break
    f_rows = chunk if chunk is not None else F_int

    # ----- generation-aware VMEM budget (75% of physical per-core VMEM) -----
    vmem_cap = 64 * 1024 * 1024
    try:
        info = pltpu.get_tpu_info()
        vmem_cap = int(getattr(info, "vmem_capacity_bytes", vmem_cap))
    except Exception:
        pass
    vmem_budget = int(0.75 * vmem_cap)             # headroom for compiler scratch

    # ----- spatial (lane) tile: sized by bytes per grid step -----
    itemsize = jnp.dtype(x_nchw.dtype).itemsize
    io_bpl = (F_g + 2 * F_l) * itemsize            # g + x in, out per spatial lane
    interm_bpl = 4 * f_rows * 4                    # f32 temporaries per lane
    weight_bytes = 2 * 4 * (F_int * (F_g + F_l) + 2 * F_int + 2)
    per_lane = 2 * io_bpl + interm_bpl             # double-buffered I/O + temps

    s_ceil = pl.cdiv(S, 128) * 128                 # one tile covering all of S
    max_ts = max(128, (vmem_budget - weight_bytes) // max(per_lane, 1))
    want_ts = max(128, pl.cdiv(int(target_tile_bytes), io_bpl))
    ts = min(want_ts, max_ts, s_ceil)
    ts = max(128, (ts // 128) * 128)

    # v7x megacore: keep >= 2 grid steps so both TensorCores get work.
    if N * pl.cdiv(S, ts) < 2 and s_ceil >= 256:
        ts = max(128, pl.cdiv(pl.cdiv(S, 2), 128) * 128)

    grid = (N, pl.cdiv(S, ts))

    vmem_limit = int(min(vmem_budget,
                         max(16 * 1024 * 1024,
                             2 * (ts * per_lane + weight_bytes))))

    kernel = (_attention_kernel if chunk is None
              else _make_chunked_kernel(chunk, F_int // chunk))

    out3 = pl.pallas_call(
        kernel,
        out_shape=jax.ShapeDtypeStruct((N, F_l, S), x_nchw.dtype),
        grid_spec=pltpu.PrefetchScalarGridSpec(
            num_scalar_prefetch=0,
            grid=grid,
            in_specs=[
                pl.BlockSpec((1, F_g, ts), lambda n, s: (n, 0, s)),   # g tile
                pl.BlockSpec((1, F_l, ts), lambda n, s: (n, 0, s)),   # x tile
                pl.BlockSpec((F_int, F_g), lambda n, s: (0, 0)),      # W_g (scale-folded)
                pl.BlockSpec((F_int, F_l), lambda n, s: (0, 0)),      # W_x (scale-folded)
                pl.BlockSpec((F_int, 1), lambda n, s: (0, 0)),        # psi weight (scale-folded)
                pl.BlockSpec((F_int, 1), lambda n, s: (0, 0)),        # merged BN_g+BN_x bias
                pl.BlockSpec((1, 1), lambda n, s: (0, 0)),            # BN_psi bias
            ],
            out_specs=pl.BlockSpec((1, F_l, ts), lambda n, s: (n, 0, s)),
        ),
        compiler_params=pltpu.CompilerParams(
            dimension_semantics=("parallel", "parallel"),
            vmem_limit_bytes=vmem_limit),
    )(g3, x3, wg, wx, wpsi, b, bp)

    # No spatial padding / slicing: out3 already has exactly (N, F_l, S).
    return out3.reshape(N, F_l, H, W)


# ---------------------------------------------------------------------------
# Parameters & reference
# ---------------------------------------------------------------------------
def make_params(key, F_g, F_l, F_int, eps=1e-5, dtype=jnp.float32):
    """Deterministic synthetic parameters matching Attention_block.__init__.

    Conv weights are stored (C_out, C_in) for the channel-contracting layout.
    BatchNorm (eval) is folded: scale = gamma / sqrt(var + eps) is multiplied
    into the conv weight; the two per-channel biases (BN_g, BN_x) are merged
    into a single additive column vector b = bias_g + bias_x.
    """
    ks = jax.random.split(key, 12)
    wg_conv = jax.random.normal(ks[0], (F_int, F_g), dtype) * 0.5
    wx_conv = jax.random.normal(ks[1], (F_int, F_l), dtype) * 0.5
    wpsi_conv = jax.random.normal(ks[2], (F_int,), dtype) * 0.5

    def bn(kg, kb, km, kv, c):
        gamma = 1.0 + 0.1 * jax.random.normal(kg, (c,), dtype)
        beta = 0.1 * jax.random.normal(kb, (c,), dtype)
        mean = 0.1 * jax.random.normal(km, (c,), dtype)
        var = jnp.abs(jax.random.normal(kv, (c,), dtype)) + 0.5
        scale = gamma / jnp.sqrt(var + eps)
        bias = beta - mean * scale
        return scale, bias

    sg, bg = bn(ks[3], ks[4], ks[5], ks[6], F_int)
    sx, bx = bn(ks[7], ks[8], ks[9], ks[10], F_int)
    kp = jax.random.split(ks[11], 4)
    sp, bp = bn(kp[0], kp[1], kp[2], kp[3], 1)

    wg = wg_conv * sg[:, None]                      # fold BN_g scale
    wx = wx_conv * sx[:, None]                      # fold BN_x scale
    wpsi = (wpsi_conv * sp[0]).reshape(F_int, 1)    # fold BN_psi scale
    b = (bg + bx).reshape(F_int, 1)                 # merged per-channel bias
    return (wg, wx, wpsi, b, bp.reshape(1, 1))


def attention_block_ref(g_nchw, x_nchw, params):
    """Pure-JAX reference (same math, no Pallas) for a sanity check."""
    wg, wx, wpsi, b, bp = params
    N, F_g, H, W = g_nchw.shape
    _, F_l, _, _ = x_nchw.shape
    g = g_nchw.reshape(N, F_g, -1).astype(jnp.float32)
    x = x_nchw.reshape(N, F_l, -1).astype(jnp.float32)
    g1 = jnp.einsum('oc,ncs->nos', wg, g)
    x1 = jnp.einsum('oc,ncs->nos', wx, x)
    h = jnp.maximum(g1 + x1 + b[None], 0.0)
    p = jax.nn.sigmoid(
        jnp.einsum('c,ncs->ns', wpsi[:, 0], h)[:, None, :] + bp[None])
    out = x * p
    return out.reshape(N, F_l, H, W).astype(x_nchw.dtype)


if __name__ == "__main__":
    # Small shapes consistent with the module: F_g = F_l = 4 channels, F_int = 8.
    N, F_g, F_l, F_int, H, W = 2, 4, 4, 8, 16, 16

    key = jax.random.PRNGKey(0)
    k_g, k_x, k_p = jax.random.split(key, 3)
    g = jax.random.normal(k_g, (N, F_g, H, W), jnp.float32)
    x = jax.random.normal(k_x, (N, F_l, H, W), jnp.float32)
    params = make_params(k_p, F_g, F_l, F_int)

    out = attention_block_pallas(g, x, params)
    out = jax.block_until_ready(out)

    ref = attention_block_ref(g, x, params)
    assert out.shape == x.shape, (out.shape, x.shape)
    assert jnp.allclose(out, ref, atol=1e-5, rtol=1e-5), "mismatch vs reference"

    print("KERNEL_OK")
</pallas_src>

<mosaic_0001>
module attributes {stable_mosaic.version = 11 : i64} {
  func.func @_attention_kernel(%arg0: i32, %arg1: i32, %arg2: memref<1x4x256xf32, #tpu.memory_space<vmem>>, %arg3: memref<1x4x256xf32, #tpu.memory_space<vmem>>, %arg4: memref<8x4xf32, #tpu.memory_space<vmem>>, %arg5: memref<8x4xf32, #tpu.memory_space<vmem>>, %arg6: memref<8x1xf32, #tpu.memory_space<vmem>>, %arg7: memref<8x1xf32, #tpu.memory_space<vmem>>, %arg8: memref<1x1xf32, #tpu.memory_space<vmem>>, %arg9: memref<1x4x256xf32, #tpu.memory_space<vmem>>) attributes {dimension_semantics = [#tpu.dimension_semantics<parallel>, #tpu.dimension_semantics<parallel>], iteration_bounds = array<i64: 2, 1>, scalar_prefetch = 0 : i64, scratch_operands = 0 : i64, tpu.core_type = #tpu.core_type<tc>, window_params = [{transform_indices = @transform_0, window_bounds = array<i64: 1, 4, 256>}, {transform_indices = @transform_1, window_bounds = array<i64: 1, 4, 256>}, {pipeline_mode = #tpu.pipeline_mode<synchronous>, transform_indices = @transform_2, window_bounds = array<i64: 8, 4>}, {pipeline_mode = #tpu.pipeline_mode<synchronous>, transform_indices = @transform_3, window_bounds = array<i64: 8, 4>}, {pipeline_mode = #tpu.pipeline_mode<synchronous>, transform_indices = @transform_4, window_bounds = array<i64: 8, 1>}, {pipeline_mode = #tpu.pipeline_mode<synchronous>, transform_indices = @transform_5, window_bounds = array<i64: 8, 1>}, {pipeline_mode = #tpu.pipeline_mode<synchronous>, transform_indices = @transform_6, window_bounds = array<i64: 1, 1>}, {transform_indices = @transform_7, window_bounds = array<i64: 1, 4, 256>}]} {
    %c0 = arith.constant 0 : index
    %c0_0 = arith.constant 0 : index
    %c0_1 = arith.constant 0 : index
    %0 = vector.load %arg2[%c0, %c0_0, %c0_1] : memref<1x4x256xf32, #tpu.memory_space<vmem>>, vector<1x4x256xf32>
    %1 = vector.shape_cast %0 : vector<1x4x256xf32> to vector<4x256xf32>
    %c0_2 = arith.constant 0 : index
    %c0_3 = arith.constant 0 : index
    %c0_4 = arith.constant 0 : index
    %2 = vector.load %arg3[%c0_2, %c0_3, %c0_4] : memref<1x4x256xf32, #tpu.memory_space<vmem>>, vector<1x4x256xf32>
    %3 = vector.shape_cast %2 : vector<1x4x256xf32> to vector<4x256xf32>
    %c0_5 = arith.constant 0 : index
    %c0_6 = arith.constant 0 : index
    %4 = vector.load %arg4[%c0_5, %c0_6] : memref<8x4xf32, #tpu.memory_space<vmem>>, vector<8x4xf32>
    %cst = arith.constant dense<0.000000e+00> : vector<8x256xf32>
    %5 = tpu.matmul %4, %1, %cst {dimension_numbers = #tpu.dot_dimension_numbers<[1], [0], [0], [1], [0, 0, 1, 1], [], []>} : vector<8x4xf32>, vector<4x256xf32>, vector<8x256xf32> -> vector<8x256xf32>
    %c0_7 = arith.constant 0 : index
    %c0_8 = arith.constant 0 : index
    %6 = vector.load %arg5[%c0_7, %c0_8] : memref<8x4xf32, #tpu.memory_space<vmem>>, vector<8x4xf32>
    %cst_9 = arith.constant dense<0.000000e+00> : vector<8x256xf32>
    %7 = tpu.matmul %6, %3, %cst_9 {dimension_numbers = #tpu.dot_dimension_numbers<[1], [0], [0], [1], [0, 0, 1, 1], [], []>} : vector<8x4xf32>, vector<4x256xf32>, vector<8x256xf32> -> vector<8x256xf32>
    %8 = arith.addf %5, %7 : vector<8x256xf32>
    %c0_10 = arith.constant 0 : index
    %c0_11 = arith.constant 0 : index
    %9 = vector.load %arg7[%c0_10, %c0_11] : memref<8x1xf32, #tpu.memory_space<vmem>>, vector<8x1xf32>
    %10 = vector.broadcast %9 : vector<8x1xf32> to vector<8x256xf32>
    %11 = arith.addf %8, %10 : vector<8x256xf32>
    %cst_12 = arith.constant 0.000000e+00 : f32
    %12 = vector.broadcast %cst_12 : f32 to vector<8x256xf32>
    %13 = arith.maximumf %11, %12 : vector<8x256xf32>
    %c0_13 = arith.constant 0 : index
    %c0_14 = arith.constant 0 : index
    %14 = vector.load %arg6[%c0_13, %c0_14] : memref<8x1xf32, #tpu.memory_space<vmem>>, vector<8x1xf32>
    %15 = vector.broadcast %14 : vector<8x1xf32> to vector<8x256xf32>
    %16 = arith.mulf %13, %15 : vector<8x256xf32>
    %cst_15 = arith.constant dense<0.000000e+00> : vector<256xf32>
    %17 = vector.multi_reduction <add>, %16, %cst_15 [0] : vector<8x256xf32> to vector<256xf32>
    %18 = vector.shape_cast %17 : vector<256xf32> to vector<1x256xf32>
    %c0_16 = arith.constant 0 : index
    %c0_17 = arith.constant 0 : index
    %19 = vector.load %arg8[%c0_16, %c0_17] : memref<1x1xf32, #tpu.memory_space<vmem>>, vector<1x1xf32>
    %20 = vector.broadcast %19 : vector<1x1xf32> to vector<1x256xf32>
    %21 = arith.addf %18, %20 : vector<1x256xf32>
    %22 = arith.negf %21 : vector<1x256xf32>
    %23 = math.exp %22 : vector<1x256xf32>
    %cst_18 = arith.constant 1.000000e+00 : f32
    %24 = vector.broadcast %cst_18 : f32 to vector<1x256xf32>
    %25 = arith.addf %24, %23 : vector<1x256xf32>
    %26 = arith.divf %24, %25 : vector<1x256xf32>
    %27 = vector.broadcast %26 : vector<1x256xf32> to vector<4x256xf32>
    %28 = arith.mulf %3, %27 : vector<4x256xf32>
    %c0_19 = arith.constant 0 : index
    %c0_20 = arith.constant 0 : index
    %c0_21 = arith.constant 0 : index
    %29 = vector.load %arg9[%c0_19, %c0_20, %c0_21] : memref<1x4x256xf32, #tpu.memory_space<vmem>>, vector<1x4x256xf32>
    %30 = vector.shape_cast %29 : vector<1x4x256xf32> to vector<4x256xf32>
    %31 = vector.shape_cast %28 : vector<4x256xf32> to vector<1x4x256xf32>
    tpu.vector_store %arg9[%c0_19, %c0_20, %c0_21], %31 {strides = array<i32>} : memref<1x4x256xf32, #tpu.memory_space<vmem>>, vector<1x4x256xf32>,
    return
  }
  func.func @transform_0(%arg0: i32, %arg1: i32) -> (i32, i32, i32) {
    %c0_i32 = arith.constant 0 : i32
    %c0_i32_0 = arith.constant 0 : i32
    return %arg0, %c0_i32, %arg1 : i32, i32, i32
  }
  func.func @transform_1(%arg0: i32, %arg1: i32) -> (i32, i32, i32) {
    %c0_i32 = arith.constant 0 : i32
    %c0_i32_0 = arith.constant 0 : i32
    return %arg0, %c0_i32, %arg1 : i32, i32, i32
  }
  func.func @transform_2(%arg0: i32, %arg1: i32) -> (i32, i32) {
    %c0_i32 = arith.constant 0 : i32
    %c0_i32_0 = arith.constant 0 : i32
    %c0_i32_1 = arith.constant 0 : i32
    return %c0_i32, %c0_i32_0 : i32, i32
  }
  func.func @transform_3(%arg0: i32, %arg1: i32) -> (i32, i32) {
    %c0_i32 = arith.constant 0 : i32
    %c0_i32_0 = arith.constant 0 : i32
    %c0_i32_1 = arith.constant 0 : i32
    return %c0_i32, %c0_i32_0 : i32, i32
  }
  func.func @transform_4(%arg0: i32, %arg1: i32) -> (i32, i32) {
    %c0_i32 = arith.constant 0 : i32
    %c0_i32_0 = arith.constant 0 : i32
    %c0_i32_1 = arith.constant 0 : i32
    return %c0_i32, %c0_i32_0 : i32, i32
  }
  func.func @transform_5(%arg0: i32, %arg1: i32) -> (i32, i32) {
    %c0_i32 = arith.constant 0 : i32
    %c0_i32_0 = arith.constant 0 : i32
    %c0_i32_1 = arith.constant 0 : i32
    return %c0_i32, %c0_i32_0 : i32, i32
  }
  func.func @transform_6(%arg0: i32, %arg1: i32) -> (i32, i32) {
    %c0_i32 = arith.constant 0 : i32
    %c0_i32_0 = arith.constant 0 : i32
    %c0_i32_1 = arith.constant 0 : i32
    return %c0_i32, %c0_i32_0 : i32, i32
  }
  func.func @transform_7(%arg0: i32, %arg1: i32) -> (i32, i32, i32) {
    %c0_i32 = arith.constant 0 : i32
    %c0_i32_0 = arith.constant 0 : i32
    return %arg0, %c0_i32, %arg1 : i32, i32, i32
  }
}

</mosaic_0001>

<bundles_post_ra>
// kernel: tpu_custom_call.1
= control target key start
LH: loop header
LB: loop body
LE: loop exit
PB: predicated region body
PF: predicated region fallthrough
CT: control target
= control target key end

     0   :  { %s1039_s0 = inlined_call_operand.vmem [shape: f32[2,4,256], index: 0, kind: input, shape index: {}]   ;;  %s1040_s1 = inlined_call_operand.vmem [shape: f32[2,4,256], index: 1, kind: input, shape index: {}]   ;;  %s1041_s2 = inlined_call_operand.vmem [shape: f32[8,4], index: 2, kind: input, shape index: {}]   ;;  %s1042_s3 = inlined_call_operand.vmem [shape: f32[8,4], index: 3, kind: input, shape index: {}]   ;;  %s1043_s4 = inlined_call_operand.vmem [shape: f32[8,1], index: 4, kind: input, shape index: {}]   ;;  %s1044_s5 = inlined_call_operand.vmem [shape: f32[8,1], index: 5, kind: input, shape index: {}]   ;;  %s1045_s6 = inlined_call_operand.<no memory space> [shape: f32[1,1], index: 6, kind: input, shape index: {}]   ;;  %s1046_s7 = inlined_call_operand.hbm [shape: f32[2,4,256], index: 7, kind: output, shape index: {}]  }
   0x1   :  { %v12_v0 = vstv %s1045_s6 }
   0x2   :  { %13 = vst [vmem:[#allocation2] sm:$0x1] %v12_v0 }
   0x3   :  { %14 = vsyncpa [#allocation4], 0 }
   0x4   :  { %16 = vsyncpa [#allocation4 + $0x1], 0  ;;  %s906_s26 = smov 0   ;;  %s908_s27 = smov 0  }
   0x5   :  { %s910_s28 = smov 0   ;;  %s912_s29 = smov 0  }
   0x6   :  { %s914_s30 = smov 0   ;;  %s916_s8 = smov 0  }
   0x7 LB: > { %s683_s6 = sadd.s32 4294967295, %s858_s8   ;;  %s684_s9 = sadd.s32 4294967294, %s858_s8   ;;  %s858_s8 = sphi %s916_s8, %s22_s8   ;;  %s854_s30 = sphi %s914_s30, %s1053_s30   ;;  %s850_s29 = sphi %s912_s29, %s1052_s29   ;;  %s846_s28 = sphi %s910_s28, %s1051_s28   ;;  %s842_s27 = sphi %s908_s27, %s1050_s27   ;;  %s838_s26 = sphi %s906_s26, %s1049_s26  }
   0x8   : > { %s34_s10 = sadd.s32 1, %s854_s30  ;;  %s204_s11 = sadd.s32 1, %s846_s28 }
   0x9   : > { %p36_p0 = scmp.ge.s32.totalorder %s34_s10, 2  ;;  %p214_p1 = scmp.ne.s32.totalorder %s846_s28, %s842_s27 }
   0xa   : > { %p215_p2 = scmp.eq.s32.totalorder %s683_s6, 1  ;;  %p220_p3 = scmp.ne.s32.totalorder %s842_s27, %s838_s26 }
   0xb   : > { %s1055_s10 = smov (%p36_p0, %s34_s10), 0  ;;  %p221_p5 = scmp.eq.s32.totalorder %s684_s9, 1 }
   0xc   : > { %p946_p4 = por %p215_p2, %p214_p1  ;;  %s199_s13 = ssub.s32 %s854_s30, %s1055_s10 }
   0xd   : > { %p687_p6 = scmp.ge.s32.totalorder %s858_s8, 1  ;;  %p202_p7 = scmp.eq.s32.totalorder %s199_s13, 0 }
   0xe   : > { %p953_p8 = por %p221_p5, %p220_p3  ;;  %p280_p9 = scmp.lt.s32.totalorder %s858_s8, 3 }
   0xf   : > { %s959_s15 = scalar_select %p202_p7, %s846_s28, %s204_s11  }
  0x10   : > { %p281_p10 = pnand %p687_p6, %p280_p9 }
  0x11   : > { %p326_p11 = scmp.lt.s32.totalorder (!%p281_p10), %s850_s29, 1  ;;  %v860_v1 = vmov (!%p281_p10), 0.0   ;;  %v512_v2 = vld [vmem:[%s1044_s5] sm:$0xff] (!%p281_p10)  ;;  %v861_v4 = vmov (!%p281_p10), 0   ;;  %vm356_vm0 = vcmask (!%p281_p10), 1043456   ;;  %vm352_vm1 = vcmask (!%p281_p10), 31744  }
  0x12   : > { %284 = sbr.rel (%p281_p10) target bundleno = 314 (0x13a), region = 48  ;;  %425 = vmatprep.mubr.f32.mxu1 (!%p281_p10), %v860_v1  ;;  %505 = vmatprep.mubr.f32.mxu0 (!%p281_p10), %v860_v1  ;;  %v542_v3 = vld [vmem:[#allocation2] sm:$0x1] (!%p281_p10)  ;;  %v548_v22 = vlaneseq (!%p281_p10)  ;;  %s708_s20 = sshll.u32 (!%p281_p10), %s850_s29, 7 }
  0x13   : > { %768 = vset.pattern.permute.xlu0 (!%p281_p10), %v861_v4  ;;  %769 = vset.pattern.permute.xlu1 (!%p281_p10), %v861_v4  ;;  %v522_v5 = vld [vmem:[%s1043_s4] sm:$0xff] (!%p281_p10)  ;;  %s992_s25 = scalar_lea.hbm (!%p281_p10), %s1046_s7, %s708_s20 }
  0x14   : > { %515 = vperm.xlu0 (!%p281_p10), %768, %v512_v2   ;;  %545 = vperm.xlu1 (!%p281_p10), %769, %v542_v3   ;;  %v349_v10 = vld [vmem:[%s1042_s3] sm:$0xff] (!%p281_p10)  ;;  %v549_v28 = vshrl.u32 (!%p281_p10), %v548_v22, 7 }
  0x15   : > { %v348_v11 = vld [vmem:[%s1041_s2] sm:$0xff] (!%p281_p10) }
  0x16   : > { %v550_v33 = vsub.s32 (!%p281_p10), 0, %v549_v28 }
  0x18   : > { %525 = vperm.xlu0 (!%p281_p10), %768, %v522_v5  }
  0x19   : > { %s327_s18 = scalar_select %p326_p11, %s850_s29, 1 }
  0x1a   : > { %s862_s29 = smov [#allocation3]  }
  0x1b   : > { %s706_s19 = sshll.u32 %s327_s18, 3  ;;  %s322_s18 = sand.u32 1, %s842_s27  }
  0x1c   : > { %s343_s24 = scalar_lea.vmem %s1040_s1, %s706_s19  ;;  %s333_s9 = scalar_lea.vmem %s1039_s0, %s706_s19 }
  0x1d   : > { %v975_v6 = vld [vmem:[%s343_s24] sm:$0xff]  ;;  %s688_s19 = sshll.u32 %s322_s18, 3  ;;  %s573_s6 = scalar_lea.sflag [#allocation4], %s322_s18 }
  0x1e   : > { %v346_v7 = vld [vmem:[%s333_s9] sm:$0xff]  ;;  %v351_v8 = vcombine.high %v975_v6, %v975_v6  ;;  %s324_s21 = scalar_lea.vmem [#allocation3], %s688_s19  ;;  %s784_s11 = sshll.u32 %s862_s29, 4  ;;  %s785_s11 = int_to_ptr.vmem [resolvable:$false] %s784_s11 }
  0x1f   : > { %v433_v9 = vcombine.high %v346_v7, %v346_v7  ;;  %s589_s22 = sshll.u32 %s324_s21, 4  ;;  %s786_s13 = scalar_lea.vmem %s785_s11, 256  ;;  %s994_s22 = int_to_ptr.vmem [resolvable:$true] %s589_s22 }
  0x20   : > { %693 = vmatprep.subr.msk.mxu1 %vm356_vm0, %v351_v8  ;;  %s780_s9 = scalar_lea.vmem %s994_s22, 128  ;;  %p787_p1 = scmp.lt.s32.totalorder %s994_s22, %s785_s11 }
  0x21   : > { %696 = vmatprep.subr.msk.mxu0 %vm356_vm0, %v433_v9  ;;  %694 = vmatpush1.msk.msra.mxu1 %vm356_vm0, %v975_v6  ;;  %p781_p12 = scmp.ne.s32.totalorder %s994_s22, %s780_s9  ;;  %p788_p2 = scmp.lt.s32.totalorder %s786_s13, %s780_s9 }
  0x22   : > { %697 = vmatpush1.msk.msra.mxu0 %vm356_vm0, %v346_v7  ;;  %695 = vmatmul.mubr.msk.f32.vlgmr.msra.gmra.mrb[0].mxu1 %vm352_vm1, %v349_v10 }
  0x23   : > { %698 = vmatmul.mubr.msk.f32.vlgmr.msra.gmra.mrb[0].mxu0 %vm352_vm1, %v348_v11  ;;  %p782_p13 = pnand %p781_p12, %p946_p4  ;;  %p789_p3 = por %p788_p2, %p787_p1 }
  0x25   : > { %p783_p0 = pneg %p782_p13 }
  0x27   : > { %p790_p5 = pnand %p789_p3, %p783_p0 }
  0x93   : > { %v516_v12 = vpop.permute.xlu0 %515  ;;  %v546_v35 = vpop.permute.xlu1 %545 }
  0x94   : > { %v551_v39 = vrot.slane %v546_v35, %v550_v33 }
  0x97   : > { %v526_v23 = vpop.permute.xlu0 %525 }
  0xf5   : > { %v427_v13 = vpop.f32.mrb[0].mxu1 }
  0xf6   : > { %v507_v14 = vpop.f32.mrb[0].mxu0  ;;  %v429_v16 = vpop.f32.mrb[1].mxu1 }
  0xf7   : > { %v508_v15 = vadd.f32 %v507_v14, %v427_v13  ;;  %v509_v17 = vpop.f32.mrb[1].mxu0 }
  0xf8   : > { %v510_v18 = vadd.f32 %v509_v17, %v429_v16 }
  0xf9   : > { %v518_v19 = vadd.f32 %v516_v12, %v508_v15 }
  0xfa   : > { %v519_v20 = vadd.f32 %v516_v12, %v510_v18 }
  0xfb   : > { %v520_v21 = vmax.f32 %v518_v19, 0.0 }
  0xfc   : > { %v521_v24 = vmax.f32 %v519_v20, 0.0 }
  0xfd   : > { %v528_v25 = vmul.f32 %v526_v23, %v520_v21 }
  0xfe   : > { %v529_v26 = vmul.f32 %v526_v23, %v521_v24 }
  0xff   : > { %v530_v27 = vrot.slane %v528_v25, 4 }
 0x100   : > { %v536_v29 = vrot.slane %v529_v26, 4 }
 0x101   : > { %v531_v30 = vadd.f32 %v530_v27, %v528_v25 }
 0x102   : > { %v537_v31 = vadd.f32 %v536_v29, %v529_v26 }
 0x103   : > { %v532_v32 = vrot.slane %v531_v30, 2 }
 0x104   : > { %v538_v34 = vrot.slane %v537_v31, 2 }
 0x105   : > { %v533_v36 = vadd.f32 %v532_v32, %v531_v30 }
 0x106   : > { %v539_v37 = vadd.f32 %v538_v34, %v537_v31 }
 0x107   : > { %v534_v38 = vrot.slane %v533_v36, 1 }
 0x108   : > { %v540_v40 = vrot.slane %v539_v37, 1 }
 0x109   : > { %v535_v41 = vadd.f32 %v534_v38, %v533_v36 }
 0x10a   : > { %v541_v42 = vadd.f32 %v540_v40, %v539_v37 }
 0x10b   : > { %v552_v43 = vadd.f32 %v551_v39, %v535_v41 }
 0x10c   : > { %v553_v44 = vadd.f32 %v551_v39, %v541_v42 }
 0x10d   : > { %v699_v45 = vmul.f32 -1.442695, %v552_v43 }
 0x10e   : > { %v700_v46 = vmul.f32 -1.442695, %v553_v44 }
 0x10f   : > { %772 = vpow2.f32 %v699_v45 }
 0x110   : > { %774 = vpow2.f32 %v700_v46 }
 0x119   : > { %v773_v47 = vpop.eup %772 }
 0x11a   : > { %v775_v48 = vpop.eup %774  ;;  %v560_v49 = vadd.f32 1.0, %v773_v47 }
 0x11b   : > { %v561_v50 = vadd.f32 1.0, %v775_v48 }
 0x11c   : > { %776 = vrcp.f32 %v560_v49 }
 0x11d   : > { %778 = vrcp.f32 %v561_v50 }
 0x126   : > { %v777_v51 = vpop.eup %776 }
 0x127   : > { %v779_v52 = vpop.eup %778 }
 0x128   : > { %v568_v53 = vcombine.low %v777_v51, %v779_v52 }
 0x12a   : > { %v570_v54 = vmul.f32 %v568_v53, %v975_v6 }
 0x12c   : > { %571 = vst [vmem:[%s324_s21] sm:$0xff] %v570_v54 }
 0x12d   : > { %793 = shalt.err (!%p790_p5)
}
 0x12e   : > { %s794_s16 = scalar_lea.hbm %s992_s25, 128  ;;  %s798_s19 = scalar_lea.hbm %s1046_s7, 256 }
 0x12f   : > { %p795_p6 = scmp.ne.s32.totalorder %s992_s25, %s794_s16  ;;  %p799_p10 = scmp.lt.u32.totalorder %s992_s25, %s1046_s7 }
 0x130   : > { %p800_p11 = scmp.lt.u32.totalorder %s798_s19, %s794_s16  ;;  %p802_p13 = scmp.lt.u32.totalorder %s794_s16, %s992_s25 }
 0x131   : > { %p796_p7 = pnand %p795_p6, %p946_p4 }
 0x132   : > { %p801_p12 = por %p800_p11, %p799_p10 }
 0x133   : > { %p797_p9 = pneg %p796_p7 }
 0x134   : > { %p803_p0 = por %p802_p13, %p801_p12 }
 0x136   : > { %p804_p1 = pnand %p803_p0, %p797_p9 }
 0x138   : > { %807 = shalt.err (!%p804_p1)
}
 0x139   : > { %711 = dma.vmem_to_hbm [thread:$0]  (%p946_p4), %s994_s22, 128, %s992_s25, %s573_s6  }
 0x13a PF: > { %p717_p2 = scmp.ge.s32.totalorder %s858_s8, 2  ;;  %s601_s23 = sand.u32 1, %s838_s26  }
 0x13b   : > { %s602_s24 = scalar_lea.sflag [#allocation4], %s601_s23 }
 0x13c   : > { %p714_p3 = pnand %p717_p2, %p953_p8 }
 0x13e   : > { %833 = dma.done.wait (!%p714_p3), %s602_s24, 128  }
 0x13f   : > { %835 = vsyncadd (!%p714_p3), %s602_s24, 4294967168  ;;  %s22_s8 = sadd.s32 1, %s858_s8   ;;  %s1049_s26 = smov %s842_s27 }
 0x140   : > { %p19_p5 = scmp.ge.s32.totalorder %s22_s8, 4   ;;  %s1050_s27 = smov %s846_s28 }
 0x141   : > { %s1051_s28 = smov %s959_s15  ;;  %s1052_s29 = smov %s854_s30 }
 0x142   : > { %s1053_s30 = smov %s1055_s10  ;;  %21 = sbr.rel (!%p19_p5) target bundleno = 7 (0x7), region = 86 }
 0x149   :  { %607 = vsyncpa [#allocation4], 1 }
 0x14a   :  { %609 = vsyncpa [#allocation4 + $0x1], 1 }

</bundles_post_ra>
